<compile_context>
chip_gen: v7x
topology: tpu7x:2x2x1
jax: 0.10.0
libtpu: 0.0.40
codegen_flags: <defaults>
</compile_context>

<pallas_src>
import math

import jax
import jax.numpy as jnp
from jax.experimental import pallas as pl
from jax.experimental.pallas import tpu as pltpu


def _round_up(n, m):
    return ((n + m - 1) // m) * m


def mlp_kernel(x_ref, w1_ref, b1_ref, w2_ref, b2_ref, w3_ref, b3_ref, o_ref):
    """One batch tile, feature-major: x_ref [17, TILE_B] -> o_ref [1, TILE_B]."""
    x = x_ref[...]                                                   # [17, B]
    h1 = jnp.dot(w1_ref[...], x, preferred_element_type=jnp.float32) + b1_ref[...]
    h1 = jnp.maximum(h1, 0.0)                                        # [64, B] f32 epilogue
    h2 = jnp.dot(w2_ref[...], h1.astype(w2_ref.dtype),
                 preferred_element_type=jnp.float32) + b2_ref[...]
    h2 = jnp.maximum(h2, 0.0)                                        # [32, B] f32 epilogue
    out = jnp.dot(w3_ref[...], h2.astype(w3_ref.dtype),
                  preferred_element_type=jnp.float32) + b3_ref[...]  # [1, B] lane-dense
    o_ref[...] = out.astype(o_ref.dtype)


def mlp_forward(x, params, *, tile_b=512, compute_dtype=jnp.float32):
    """x: [N, 17] float32 -> [N, 1] float32."""
    w1, b1, w2, b2, w3, b3 = params
    n, d_in = x.shape

    # Batch tile: multiple of 128 (lane width), capped so tiny batches don't over-pad.
    tile_b = min(tile_b, _round_up(max(n, 1), 128))
    tile_b = _round_up(tile_b, 128)
    n_pad = _round_up(max(n, 1), tile_b)

    # Feature-major, zero-padded batch; operands optionally in bf16 (f32 accumulation).
    x_t = jnp.zeros((d_in, n_pad), compute_dtype).at[:, :n].set(x.T.astype(compute_dtype))
    w1c = w1.astype(compute_dtype)
    w2c = w2.astype(compute_dtype)
    w3c = w3.astype(compute_dtype)
    # Biases stay f32: added to the f32 MXU accumulator in the epilogue.

    grid = (n_pad // tile_b,)

    def resident(shape):
        # Constant block index -> parameter stays VMEM-resident across all grid steps.
        return pl.BlockSpec(shape, lambda i: (0, 0))

    out_t = pl.pallas_call(
        mlp_kernel,
        out_shape=jax.ShapeDtypeStruct((1, n_pad), jnp.float32),
        grid=grid,
        in_specs=[
            pl.BlockSpec((d_in, tile_b), lambda i: (0, i)),   # streamed x tiles
            resident(w1c.shape), resident(b1.shape),
            resident(w2c.shape), resident(b2.shape),
            resident(w3c.shape), resident(b3.shape),
        ],
        out_specs=pl.BlockSpec((1, tile_b), lambda i: (0, i)),
        compiler_params=pltpu.CompilerParams(
            dimension_semantics=("parallel",),                # v7x megacore sharding
        ),
    )(x_t, w1c, b1, w2c, b2, w3c, b3)

    return out_t[:, :n].T                                     # [N, 1] float32


def init_linear_params(key, fan_in, fan_out):
    """Deterministic init mimicking PyTorch nn.Linear defaults.

    Weights kept in PyTorch-native [out, in] layout (kernel computes W @ x),
    biases as [out, 1] columns so they broadcast across the batch/lane axis.
    """
    k_w, k_b = jax.random.split(key)
    bound = 1.0 / math.sqrt(fan_in)
    w = jax.random.uniform(k_w, (fan_out, fan_in), jnp.float32, -bound, bound)
    b = jax.random.uniform(k_b, (fan_out, 1), jnp.float32, -bound, bound)
    return w, b


def init_mlp_params(key):
    k1, k2, k3 = jax.random.split(key, 3)
    w1, b1 = init_linear_params(k1, 17, 64)
    w2, b2 = init_linear_params(k2, 64, 32)
    w3, b3 = init_linear_params(k3, 32, 1)
    return (w1, b1, w2, b2, w3, b3)


def mlp_ref(x, params):
    """Pure-JAX reference (batch-major, matches the PyTorch module)."""
    w1, b1, w2, b2, w3, b3 = params
    h1 = jnp.maximum(x @ w1.T + b1.T, 0.0)
    h2 = jnp.maximum(h1 @ w2.T + b2.T, 0.0)
    return h2 @ w3.T + b3.T


if __name__ == "__main__":
    key = jax.random.PRNGKey(0)
    k_params, k_x1, k_x2 = jax.random.split(key, 3)
    params = init_mlp_params(k_params)

    # Small batch matching the module's grid_resolution=50 query points, 17 features each.
    x_small = jax.random.normal(k_x1, (50, 17), jnp.float32)
    out = jax.block_until_ready(mlp_forward(x_small, params))
    ref = mlp_ref(x_small, params)
    assert out.shape == (50, 1), out.shape
    assert jnp.allclose(out, ref, atol=1e-5, rtol=1e-5), "f32 mismatch vs reference"

    # Multi-tile grid path: padding + streamed x tiles over a 3-step batch grid.
    x_big = jax.random.normal(k_x2, (300, 17), jnp.float32)
    out_big = jax.block_until_ready(mlp_forward(x_big, params, tile_b=128))
    ref_big = mlp_ref(x_big, params)
    assert out_big.shape == (300, 1), out_big.shape
    assert jnp.allclose(out_big, ref_big, atol=1e-5, rtol=1e-5), "tiled f32 mismatch"

    # bf16 operands + f32 accumulation/epilogue (v5e/v6e MXU fast path), relaxed tolerance.
    out_bf16 = jax.block_until_ready(
        mlp_forward(x_big, params, tile_b=128, compute_dtype=jnp.bfloat16))
    assert jnp.allclose(out_bf16, ref_big, atol=5e-2, rtol=5e-2), "bf16 mismatch"

    print("KERNEL_OK")
</pallas_src>

<mosaic_0001>
module attributes {stable_mosaic.version = 11 : i64} {
  func.func @mlp_kernel(%arg0: i32, %arg1: memref<17x128xf32, #tpu.memory_space<vmem>>, %arg2: memref<64x17xf32, #tpu.memory_space<vmem>>, %arg3: memref<64x1xf32, #tpu.memory_space<vmem>>, %arg4: memref<32x64xf32, #tpu.memory_space<vmem>>, %arg5: memref<32x1xf32, #tpu.memory_space<vmem>>, %arg6: memref<1x32xf32, #tpu.memory_space<vmem>>, %arg7: memref<1x1xf32, #tpu.memory_space<vmem>>, %arg8: memref<1x128xf32, #tpu.memory_space<vmem>>) attributes {dimension_semantics = [#tpu.dimension_semantics<parallel>], iteration_bounds = array<i64: 1>, scalar_prefetch = 0 : i64, scratch_operands = 0 : i64, tpu.core_type = #tpu.core_type<tc>, window_params = [{transform_indices = @transform_0, window_bounds = array<i64: 17, 128>}, {pipeline_mode = #tpu.pipeline_mode<synchronous>, transform_indices = @transform_1, window_bounds = array<i64: 64, 17>}, {pipeline_mode = #tpu.pipeline_mode<synchronous>, transform_indices = @transform_2, window_bounds = array<i64: 64, 1>}, {pipeline_mode = #tpu.pipeline_mode<synchronous>, transform_indices = @transform_3, window_bounds = array<i64: 32, 64>}, {pipeline_mode = #tpu.pipeline_mode<synchronous>, transform_indices = @transform_4, window_bounds = array<i64: 32, 1>}, {pipeline_mode = #tpu.pipeline_mode<synchronous>, transform_indices = @transform_5, window_bounds = array<i64: 1, 32>}, {pipeline_mode = #tpu.pipeline_mode<synchronous>, transform_indices = @transform_6, window_bounds = array<i64: 1, 1>}, {transform_indices = @transform_7, window_bounds = array<i64: 1, 128>}]} {
    %c0 = arith.constant 0 : index
    %c0_0 = arith.constant 0 : index
    %0 = vector.load %arg1[%c0, %c0_0] : memref<17x128xf32, #tpu.memory_space<vmem>>, vector<17x128xf32>
    %c0_1 = arith.constant 0 : index
    %c0_2 = arith.constant 0 : index
    %1 = vector.load %arg2[%c0_1, %c0_2] : memref<64x17xf32, #tpu.memory_space<vmem>>, vector<64x17xf32>
    %cst = arith.constant dense<0.000000e+00> : vector<64x128xf32>
    %2 = tpu.matmul %1, %0, %cst {dimension_numbers = #tpu.dot_dimension_numbers<[1], [0], [0], [1], [0, 0, 1, 1], [], []>} : vector<64x17xf32>, vector<17x128xf32>, vector<64x128xf32> -> vector<64x128xf32>
    %c0_3 = arith.constant 0 : index
    %c0_4 = arith.constant 0 : index
    %3 = vector.load %arg3[%c0_3, %c0_4] : memref<64x1xf32, #tpu.memory_space<vmem>>, vector<64x1xf32>
    %4 = vector.broadcast %3 : vector<64x1xf32> to vector<64x128xf32>
    %5 = arith.addf %2, %4 : vector<64x128xf32>
    %cst_5 = arith.constant 0.000000e+00 : f32
    %6 = vector.broadcast %cst_5 : f32 to vector<64x128xf32>
    %7 = arith.maximumf %5, %6 : vector<64x128xf32>
    %c0_6 = arith.constant 0 : index
    %c0_7 = arith.constant 0 : index
    %8 = vector.load %arg4[%c0_6, %c0_7] : memref<32x64xf32, #tpu.memory_space<vmem>>, vector<32x64xf32>
    %cst_8 = arith.constant dense<0.000000e+00> : vector<32x128xf32>
    %9 = tpu.matmul %8, %7, %cst_8 {dimension_numbers = #tpu.dot_dimension_numbers<[1], [0], [0], [1], [0, 0, 1, 1], [], []>} : vector<32x64xf32>, vector<64x128xf32>, vector<32x128xf32> -> vector<32x128xf32>
    %c0_9 = arith.constant 0 : index
    %c0_10 = arith.constant 0 : index
    %10 = vector.load %arg5[%c0_9, %c0_10] : memref<32x1xf32, #tpu.memory_space<vmem>>, vector<32x1xf32>
    %11 = vector.broadcast %10 : vector<32x1xf32> to vector<32x128xf32>
    %12 = arith.addf %9, %11 : vector<32x128xf32>
    %cst_11 = arith.constant 0.000000e+00 : f32
    %13 = vector.broadcast %cst_11 : f32 to vector<32x128xf32>
    %14 = arith.maximumf %12, %13 : vector<32x128xf32>
    %c0_12 = arith.constant 0 : index
    %c0_13 = arith.constant 0 : index
    %15 = vector.load %arg6[%c0_12, %c0_13] : memref<1x32xf32, #tpu.memory_space<vmem>>, vector<1x32xf32>
    %cst_14 = arith.constant dense<0.000000e+00> : vector<1x128xf32>
    %16 = tpu.matmul %15, %14, %cst_14 {dimension_numbers = #tpu.dot_dimension_numbers<[1], [0], [0], [1], [0, 0, 1, 1], [], []>} : vector<1x32xf32>, vector<32x128xf32>, vector<1x128xf32> -> vector<1x128xf32>
    %c0_15 = arith.constant 0 : index
    %c0_16 = arith.constant 0 : index
    %17 = vector.load %arg7[%c0_15, %c0_16] : memref<1x1xf32, #tpu.memory_space<vmem>>, vector<1x1xf32>
    %18 = vector.broadcast %17 : vector<1x1xf32> to vector<1x128xf32>
    %19 = arith.addf %16, %18 : vector<1x128xf32>
    %c0_17 = arith.constant 0 : index
    %c0_18 = arith.constant 0 : index
    %20 = vector.load %arg8[%c0_17, %c0_18] : memref<1x128xf32, #tpu.memory_space<vmem>>, vector<1x128xf32>
    tpu.vector_store %arg8[%c0_17, %c0_18], %19 {strides = array<i32>} : memref<1x128xf32, #tpu.memory_space<vmem>>, vector<1x128xf32>,
    return
  }
  func.func @transform_0(%arg0: i32) -> (i32, i32) {
    %c0_i32 = arith.constant 0 : i32
    %c0_i32_0 = arith.constant 0 : i32
    return %c0_i32, %arg0 : i32, i32
  }
  func.func @transform_1(%arg0: i32) -> (i32, i32) {
    %c0_i32 = arith.constant 0 : i32
    %c0_i32_0 = arith.constant 0 : i32
    %c0_i32_1 = arith.constant 0 : i32
    return %c0_i32, %c0_i32_0 : i32, i32
  }
  func.func @transform_2(%arg0: i32) -> (i32, i32) {
    %c0_i32 = arith.constant 0 : i32
    %c0_i32_0 = arith.constant 0 : i32
    %c0_i32_1 = arith.constant 0 : i32
    return %c0_i32, %c0_i32_0 : i32, i32
  }
  func.func @transform_3(%arg0: i32) -> (i32, i32) {
    %c0_i32 = arith.constant 0 : i32
    %c0_i32_0 = arith.constant 0 : i32
    %c0_i32_1 = arith.constant 0 : i32
    return %c0_i32, %c0_i32_0 : i32, i32
  }
  func.func @transform_4(%arg0: i32) -> (i32, i32) {
    %c0_i32 = arith.constant 0 : i32
    %c0_i32_0 = arith.constant 0 : i32
    %c0_i32_1 = arith.constant 0 : i32
    return %c0_i32, %c0_i32_0 : i32, i32
  }
  func.func @transform_5(%arg0: i32) -> (i32, i32) {
    %c0_i32 = arith.constant 0 : i32
    %c0_i32_0 = arith.constant 0 : i32
    %c0_i32_1 = arith.constant 0 : i32
    return %c0_i32, %c0_i32_0 : i32, i32
  }
  func.func @transform_6(%arg0: i32) -> (i32, i32) {
    %c0_i32 = arith.constant 0 : i32
    %c0_i32_0 = arith.constant 0 : i32
    %c0_i32_1 = arith.constant 0 : i32
    return %c0_i32, %c0_i32_0 : i32, i32
  }
  func.func @transform_7(%arg0: i32) -> (i32, i32) {
    %c0_i32 = arith.constant 0 : i32
    %c0_i32_0 = arith.constant 0 : i32
    return %c0_i32, %arg0 : i32, i32
  }
}

</mosaic_0001>

<bundles_post_ra>
// kernel: tpu_custom_call.1
= control target key start
LH: loop header
LB: loop body
LE: loop exit
PB: predicated region body
PF: predicated region fallthrough
CT: control target
= control target key end

     0   :  { %s768_s0 = inlined_call_operand.vmem [shape: f32[17,128], index: 0, kind: input, shape index: {}]   ;;  %s769_s1 = inlined_call_operand.vmem [shape: f32[64,17], index: 1, kind: input, shape index: {}]   ;;  %s770_s2 = inlined_call_operand.vmem [shape: f32[64,1], index: 2, kind: input, shape index: {}]   ;;  %s771_s3 = inlined_call_operand.vmem [shape: f32[32,64], index: 3, kind: input, shape index: {}]   ;;  %s772_s4 = inlined_call_operand.vmem [shape: f32[32,1], index: 4, kind: input, shape index: {}]   ;;  %s773_s5 = inlined_call_operand.vmem [shape: f32[1,32], index: 5, kind: input, shape index: {}]   ;;  %s774_s6 = inlined_call_operand.<no memory space> [shape: f32[1,1], index: 6, kind: input, shape index: {}]   ;;  %s775_s7 = inlined_call_operand.hbm [shape: f32[1,128], index: 7, kind: output, shape index: {}]  }
   0x1   :  { %v12_v0 = vstv %s774_s6 }
   0x2   :  { %13 = vst [vmem:[#allocation2] sm:$0x1] %v12_v0 }
   0x3   :  { %v29_v1 = vld [vmem:[%s768_s0] sm:$0xff]  ;;  %v30_v2 = vld [vmem:[%s768_s0 + $0x8] sm:$0xff]  ;;  %vm88_vm0 = vcmask 138240   ;;  %v31_v5 = vld [vmem:[%s768_s0 + $0x10] sm:$0x1]  ;;  %vm113_vm1 = vcmask 1040384  }
   0x4   :  { %v553_v3 = vpack.c.bf16 %v30_v2, %v29_v1  ;;  %v32_v4 = vld [vmem:[%s769_s1] sm:$0xff]  ;;  %v610_v6 = vmov 0   ;;  %v42_v8 = vld [vmem:[%s770_s2 + $0x10] sm:$0xff]  ;;  %v41_v9 = vld [vmem:[%s770_s2 + $0x8] sm:$0xff] }
   0x5   :  { %508 = vmatprep.mubr.msk.f32.mxu0 %vm88_vm0, %v32_v4  ;;  %584 = vset.pattern.permute.xlu0 %v610_v6  ;;  %v40_v7 = vld [vmem:[%s770_s2] sm:$0xff]  ;;  %v33_v10 = vld [vmem:[%s769_s1 + $0x8] sm:$0xff]  ;;  %v43_v11 = vld [vmem:[%s770_s2 + $0x18] sm:$0xff] }
   0x6   :  { %554 = vmatprep.subr.bf16.mxu0 %v553_v3  ;;  %585 = vset.pattern.permute.xlu1 %v610_v6  ;;  %v34_v12 = vld [vmem:[%s769_s1 + $0x10] sm:$0xff] }
   0x7   :  { %556 = vmatpush3.bf16.msra.mxu0 %v553_v3  ;;  %50 = vperm.xlu0 %584, %v40_v7  }
   0x8   :  { %506 = vmatprep.subr.msk.mxu0 %vm113_vm1, %v31_v5  ;;  %60 = vperm.xlu1 %585, %v42_v8  }
   0xb   :  { %507 = vmatpush3.msk.msra.mxu0 %vm113_vm1, %v31_v5  ;;  %55 = vperm.xlu0 %584, %v41_v9  }
   0xc   :  { %14 = vsyncpa [#allocation4], 0  ;;  %509 = vmatmul.mubr.msk.f32.vlgmr.msra.gmra.mrb[0].mxu0 %vm88_vm0, %v33_v10  ;;  %v44_v13 = vld [vmem:[%s770_s2 + $0x20] sm:$0xff]  ;;  %65 = vperm.xlu1 %585, %v43_v11   ;;  %v35_v14 = vld [vmem:[%s769_s1 + $0x18] sm:$0xff]  ;;  %vm258_vm2 = vcmask 523264   ;;  %v611_v3 = vmov 0.0|0.0  }
   0xd   :  { %511 = vmatprep.mubr.msk.f32.mxu0 %vm88_vm0, %v34_v12  ;;  %v45_v15 = vld [vmem:[%s770_s2 + $0x28] sm:$0xff]  ;;  %v36_v16 = vld [vmem:[%s769_s1 + $0x20] sm:$0xff]  ;;  %v46_v17 = vld [vmem:[%s770_s2 + $0x30] sm:$0xff]  ;;  %573 = vmatprep.subr.bf16.mxu0 %v611_v3  ;;  %vm612_vm3 = vmmov 0   ;;  %v613_v4 = vmov 0.0   ;;  %vm371_vm4 = vcmask 261120  }
   0xe   :  { %v37_v18 = vld [vmem:[%s769_s1 + $0x28] sm:$0xff]  ;;  %v47_v19 = vld [vmem:[%s770_s2 + $0x38] sm:$0xff]  ;;  %v38_v20 = vld [vmem:[%s769_s1 + $0x30] sm:$0xff]  ;;  %s614_s28 = smov [#allocation3]  }
   0xf   :  { %70 = vperm.xlu0 %584, %v44_v13   ;;  %v234_v21 = vld [vmem:[%s772_s4] sm:$0xff]  ;;  %v39_v22 = vld [vmem:[%s769_s1 + $0x38] sm:$0xff]  ;;  %v235_v23 = vld [vmem:[%s772_s4 + $0x8] sm:$0xff]  ;;  %s452_s29 = sshll.u32 %s614_s28, 4  ;;  %s453_s29 = int_to_ptr.vmem [resolvable:$true] %s452_s29 }
  0x10   :  { %512 = vmatmul.mubr.msk.f32.gmra.mrb[2].mxu0 %vm88_vm0, %v35_v14  ;;  %75 = vperm.xlu1 %585, %v45_v15   ;;  %v236_v24 = vld [vmem:[%s772_s4 + $0x10] sm:$0xff]  ;;  %v237_v25 = vld [vmem:[%s772_s4 + $0x18] sm:$0xff]  ;;  %v361_v26 = vld [vmem:[#allocation2] sm:$0x1]  ;;  %s586_s30 = scalar_lea.vmem %s453_s29, 16  ;;  %s590_s8 = scalar_lea.vmem %s453_s29, 32 }
  0x11   :  { %514 = vmatprep.mubr.msk.f32.mxu0 %vm88_vm0, %v36_v16  ;;  %v230_v27 = vld [vmem:[%s771_s3] sm:$0xff]  ;;  %v231_v0 = vld [vmem:[%s771_s3 + $0x8] sm:$0xff]  ;;  %v232_v1 = vld [vmem:[%s771_s3 + $0x10] sm:$0xff]  ;;  %p587_p0 = scmp.ne.s32.totalorder %s453_s29, %s586_s30  ;;  %p591_p1 = scmp.lt.s32.totalorder %s453_s29, %s453_s29 }
  0x12   :  { %536 = vmatprep.mubr.msk.f32.mxu1 %vm258_vm2, %v230_v27  ;;  %v233_v2 = vld [vmem:[%s771_s3 + $0x18] sm:$0xff]  ;;  %p592_p2 = scmp.lt.s32.totalorder %s590_s8, %s586_s30 }
  0x13   :  { %80 = vperm.xlu0 %584, %v46_v17  }
  0x14   :  { %515 = vmatmul.mubr.msk.f32.gmra.mrb[4].mxu0 %vm88_vm0, %v37_v18  ;;  %85 = vperm.xlu1 %585, %v47_v19   ;;  %p593_p3 = por %p592_p2, %p591_p1 }
  0x15   :  { %517 = vmatprep.mubr.msk.f32.mxu0 %vm88_vm0, %v38_v20 }
  0x16   :  { %p594_p4 = pnand %p593_p3, %p587_p0 }
  0x17   :  { %240 = vperm.xlu0 %584, %v234_v21  }
  0x18   :  { %518 = vmatmul.mubr.msk.f32.gmra.mrb[6].mxu0 %vm88_vm0, %v39_v22  ;;  %245 = vperm.xlu1 %585, %v235_v23   ;;  %v360_v23 = vld [vmem:[%s773_s5] sm:$0x1] }
  0x19   :  { %550 = vmatprep.mubr.msk.f32.mxu0 %vm612_vm3, %v613_v4 }
  0x1b   :  { %250 = vperm.xlu0 %584, %v236_v24   ;;  %v367_v24 = vlaneseq }
  0x1c   :  { %255 = vperm.xlu1 %585, %v237_v25  }
  0x1d   :  { %v368_v25 = vshrl.u32 %v367_v24, 7 }
  0x1f   :  { %364 = vperm.xlu0 %584, %v361_v26   ;;  %v369_v26 = vsub.s32 0, %v368_v25 }
  0x86   :  { %v51_v28 = vpop.permute.xlu0 %50 }
  0x87   :  { %v61_v29 = vpop.permute.xlu1 %60 }
  0x8a   :  { %v56_v30 = vpop.permute.xlu0 %55 }
  0x8b   :  { %v66_v31 = vpop.permute.xlu1 %65 }
  0x8e   :  { %v71_v44 = vpop.permute.xlu0 %70 }
  0x8f   :  { %v76_v41 = vpop.permute.xlu1 %75 }
  0x92   :  { %v81_v56 = vpop.permute.xlu0 %80 }
  0x93   :  { %v86_v53 = vpop.permute.xlu1 %85 }
  0x96   :  { %v241_v6 = vpop.permute.xlu0 %240 }
  0x97   :  { %v246_v5 = vpop.permute.xlu1 %245 }
  0x9a   :  { %v251_v15 = vpop.permute.xlu0 %250 }
  0x9b   :  { %v256_v12 = vpop.permute.xlu1 %255 }
  0x9e   :  { %v365_v27 = vpop.permute.xlu0 %364 }
  0xdf   :  { %v510_v32 = vpop.f32.mrb[0].mxu0 }
  0xe0   :  { %v189_v33 = vadd.f32 %v510_v32, %v56_v30  ;;  %v183_v34 = vpop.f32.mrb[1].mxu0 }
  0xe1   :  { %v184_v35 = vadd.f32 %v183_v34, %v51_v28  ;;  %v370_v28 = vrot.slane %v365_v27, %v369_v26 }
  0xe2   :  { %v223_v36 = vmax.f32 %v189_v33, 0.0 }
  0xe3   :  { %v222_v37 = vmax.f32 %v184_v35, 0.0  ;;  %v513_v38 = vpop.f32.mrb[2].mxu0 }
  0xe4   :  { %v199_v39 = vadd.f32 %v513_v38, %v66_v31  ;;  %v193_v40 = vpop.f32.mrb[3].mxu0 }
  0xe5   :  { %v194_v42 = vadd.f32 %v193_v40, %v61_v29  ;;  %v557_v43 = vpack.c.bf16 %v223_v36, %v222_v37 }
  0xe6   :  { %v225_v45 = vmax.f32 %v199_v39, 0.0 }
  0xe7   :  { %v224_v46 = vmax.f32 %v194_v42, 0.0  ;;  %v516_v47 = vpop.f32.mrb[4].mxu0  ;;  %558 = vmatprep.subr.bf16.mxu1 %v557_v43 }
  0xe8   :  { %v209_v48 = vadd.f32 %v516_v47, %v76_v41  ;;  %v203_v49 = vpop.f32.mrb[5].mxu0  ;;  %560 = vmatpush3.bf16.msra.mxu1 %v557_v43 }
  0xe9   :  { %v561_v50 = vpack.c.bf16 %v225_v45, %v224_v46  ;;  %v204_v51 = vadd.f32 %v203_v49, %v71_v44 }
  0xea   :  { %v227_v52 = vmax.f32 %v209_v48, 0.0 }
  0xeb   :  { %v226_v54 = vmax.f32 %v204_v51, 0.0  ;;  %v519_v55 = vpop.f32.mrb[6].mxu0  ;;  %562 = vmatprep.subr.bf16.mxu1 %v561_v50 }
  0xec   :  { %v219_v57 = vadd.f32 %v519_v55, %v86_v53  ;;  %v213_v58 = vpop.f32.mrb[7].mxu0  ;;  %564 = vmatpush3.bf16.msra.mxu1 %v561_v50 }
  0xed   :  { %v565_v59 = vpack.c.bf16 %v227_v52, %v226_v54  ;;  %v214_v60 = vadd.f32 %v213_v58, %v81_v56 }
  0xee   :  { %v229_v61 = vmax.f32 %v219_v57, 0.0 }
  0xef   :  { %v228_v62 = vmax.f32 %v214_v60, 0.0  ;;  %566 = vmatprep.subr.bf16.mxu1 %v565_v59 }
  0xf0   :  { %568 = vmatpush3.bf16.msra.mxu1 %v565_v59 }
  0xf1   :  { %v569_v63 = vpack.c.bf16 %v229_v61, %v228_v62 }
  0xf3   :  { %570 = vmatprep.subr.bf16.mxu1 %v569_v63 }
  0xf4   :  { %572 = vmatpush3.bf16.msra.mxu1 %v569_v63 }
  0xf7   :  { %537 = vmatmul.mubr.msk.f32.vlgmr.msra.gmra.mrb[0].mxu1 %vm258_vm2, %v231_v0 }
  0xf8   :  { %539 = vmatprep.mubr.msk.f32.mxu1 %vm258_vm2, %v232_v1 }
  0xfb   :  { %540 = vmatmul.mubr.msk.f32.gmra.mrb[2].mxu1 %vm258_vm2, %v233_v2 }
 0x1ca   :  { %v538_v7 = vpop.f32.mrb[0].mxu1 }
 0x1cb   :  { %v343_v8 = vadd.f32 %v538_v7, %v246_v5  ;;  %v337_v9 = vpop.f32.mrb[1].mxu1 }
 0x1cc   :  { %v338_v10 = vadd.f32 %v337_v9, %v241_v6 }
 0x1cd   :  { %v357_v11 = vmax.f32 %v343_v8, 0.0 }
 0x1ce   :  { %v356_v13 = vmax.f32 %v338_v10, 0.0  ;;  %v541_v14 = vpop.f32.mrb[2].mxu1 }
 0x1cf   :  { %v353_v16 = vadd.f32 %v541_v14, %v256_v12  ;;  %v347_v17 = vpop.f32.mrb[3].mxu1 }
 0x1d0   :  { %v574_v18 = vpack.c.bf16 %v357_v11, %v356_v13  ;;  %v348_v19 = vadd.f32 %v347_v17, %v251_v15 }
 0x1d1   :  { %v359_v20 = vmax.f32 %v353_v16, 0.0 }
 0x1d2   :  { %v358_v21 = vmax.f32 %v348_v19, 0.0  ;;  %575 = vmatpush3.bf16.msra.mxu0 %v574_v18 }
 0x1d3   :  { %576 = vmatprep.subr.bf16.mxu0 %v611_v3 }
 0x1d4   :  { %v577_v22 = vpack.c.bf16 %v359_v20, %v358_v21 }
 0x1d6   :  { %578 = vmatpush3.bf16.msra.mxu0 %v577_v22 }
 0x1d9   :  { %551 = vmatmul.mubr.msk.f32.vlgmr.msra.gmra.mrb[8].mxu0 %vm371_vm4, %v360_v23 }
 0x2ac   :  { %v441_v29 = vpop.f32.mrb[8].mxu0 }
 0x2ad   :  { %v442_v30 = vadd.f32 %v441_v29, %v370_v28  ;;  %v552_v31 = vpop.f32.mrb[9].mxu0 }
 0x2af   :  { %445 = vst [vmem:[#allocation3] sm:$0x1] %v442_v30 }
 0x2b0   :  { %597 = shalt.err (!%p594_p4)
}
 0x2b1   :  { %s598_s10 = scalar_lea.hbm %s775_s7, 16 }
 0x2b2   :  { %p599_p5 = scmp.ne.s32.totalorder %s775_s7, %s598_s10  ;;  %p602_p6 = scmp.lt.u32.totalorder %s598_s10, %s775_s7 }
 0x2b4   :  { %p604_p7 = pnand %p602_p6, %p599_p5 }
 0x2b6   :  { %607 = shalt.err (!%p604_p7)
}
 0x2b7   :  { %455 = dma.vmem_to_hbm [thread:$0]  %s453_s29, 16, %s775_s7, [#allocation4]  }
 0x2b8   :  { %608 = dma.done.wait [#allocation4], 16  }
 0x2b9   :  { %609 = vsyncadd [#allocation4], 4294967280 }
 0x2ba   :  { %459 = vsyncpa [#allocation4], 1 }

</bundles_post_ra>
